<compile_context>
chip_gen: v7x
topology: tpu7x:2x2x1
jax: 0.10.0
libtpu: 0.0.40
codegen_flags: <defaults>
</compile_context>

<pallas_src>
import math

import jax
import jax.numpy as jnp
import numpy as np
from jax.experimental import pallas as pl
from jax.experimental.pallas import tpu as pltpu

# ---------------- config (small, consistent with the module) ----------------
BATCH = 2
SEQ = 8               # power of two (used for the block-diagonal batch mask)
EMBED = 32            # config.embedding_dimensions
NUM_HEADS = 4         # config.num_attention_heads
HEAD_DIM = EMBED // NUM_HEADS
INTER = 64            # config.intermediate_size
LN_EPS = 1e-5
NTOK = BATCH * SEQ    # total rows processed by the single program

assert SEQ & (SEQ - 1) == 0, "SEQ must be a power of two for the xor batch mask"


def _gelu_exact(x):
    # torch nn.GELU() default: exact erf-based GELU
    return 0.5 * x * (1.0 + jax.lax.erf(x * (1.0 / math.sqrt(2.0))))


def _layer_norm(x, gamma, beta):
    mu = jnp.mean(x, axis=-1, keepdims=True)
    var = jnp.mean((x - mu) ** 2, axis=-1, keepdims=True)
    return (x - mu) * jax.lax.rsqrt(var + LN_EPS) * gamma + beta


# rows of the packed vector-parameter table (shape (8, 3*EMBED))
_ROW_LN1_G, _ROW_LN1_B, _ROW_LN2_G, _ROW_LN2_B = 0, 1, 2, 3
_ROW_BQKV, _ROW_BO, _ROW_B1, _ROW_B2 = 4, 5, 6, 7

# contract last dim of lhs with last dim of rhs (q @ k^T without the transpose)
_NT_DIMS = (((1,), (1,)), ((), ()))


def encoder_kernel(x_ref, wqkv_ref, wo_ref, w1_ref, w2_ref, vec_ref, o_ref):
    x = x_ref[...]                                   # (NTOK, D)
    vecs = vec_ref[...]                              # (8, 3*D)

    ln1_g = vecs[_ROW_LN1_G:_ROW_LN1_G + 1, 0:EMBED]
    ln1_b = vecs[_ROW_LN1_B:_ROW_LN1_B + 1, 0:EMBED]
    ln2_g = vecs[_ROW_LN2_G:_ROW_LN2_G + 1, 0:EMBED]
    ln2_b = vecs[_ROW_LN2_B:_ROW_LN2_B + 1, 0:EMBED]
    bqkv = vecs[_ROW_BQKV:_ROW_BQKV + 1, 0:3 * EMBED]
    bo = vecs[_ROW_BO:_ROW_BO + 1, 0:EMBED]
    b1 = vecs[_ROW_B1:_ROW_B1 + 1, 0:INTER]
    b2 = vecs[_ROW_B2:_ROW_B2 + 1, 0:EMBED]

    # ---- pre-LN 1 + multi-head self-attention ----
    h = _layer_norm(x, ln1_g, ln1_b)
    # fused q|k|v projection; q columns already carry the 1/sqrt(head_dim) scale
    qkv = jnp.dot(h, wqkv_ref[...], preferred_element_type=jnp.float32) + bqkv  # (NTOK, 3D)

    # block-diagonal mask: token i and token j interact iff same batch element.
    r = jax.lax.broadcasted_iota(jnp.int32, (NTOK, NTOK), 0)
    c = jax.lax.broadcasted_iota(jnp.int32, (NTOK, NTOK), 1)
    same_batch = jnp.bitwise_xor(r, c) < SEQ          # floor(i/SEQ) == floor(j/SEQ)

    head_outs = []
    for hh in range(NUM_HEADS):                       # static python loop (4 heads)
        lo = hh * HEAD_DIM
        qh = qkv[:, lo:lo + HEAD_DIM]                         # (NTOK, hd), pre-scaled
        kh = qkv[:, EMBED + lo:EMBED + lo + HEAD_DIM]
        vh = qkv[:, 2 * EMBED + lo:2 * EMBED + lo + HEAD_DIM]
        s = jax.lax.dot_general(qh, kh, _NT_DIMS,
                                preferred_element_type=jnp.float32)  # (NTOK, NTOK)
        s = jnp.where(same_batch, s, -1e30)
        s = s - jnp.max(s, axis=-1, keepdims=True)
        p = jnp.exp(s)
        p = p * pl.reciprocal(jnp.sum(p, axis=-1, keepdims=True), approx=True)
        head_outs.append(jnp.dot(p, vh, preferred_element_type=jnp.float32))
    ctx = jnp.concatenate(head_outs, axis=-1)         # (NTOK, D) == torch.cat(heads)

    attn = jnp.dot(ctx, wo_ref[...], preferred_element_type=jnp.float32) + bo
    x1 = x + attn                                     # residual 1

    # ---- pre-LN 2 + feed-forward ----
    h2 = _layer_norm(x1, ln2_g, ln2_b)
    ff = jnp.dot(h2, w1_ref[...], preferred_element_type=jnp.float32) + b1
    ff = _gelu_exact(ff)
    ff = jnp.dot(ff, w2_ref[...], preferred_element_type=jnp.float32) + b2
    # dropout == identity (eval)

    o_ref[...] = x1 + ff                              # residual 2


def pack_params(params):
    """One-time parameter prep: fuse QKV, fold attention scale, pack vectors."""
    (ln1_g, ln1_b, wq, bq, wk, bk, wv, bv, wo, bo,
     ln2_g, ln2_b, w1, b1, w2, b2) = params
    scale = 1.0 / np.sqrt(HEAD_DIM)
    wqkv = jnp.concatenate([wq * scale, wk, wv], axis=1)       # (D, 3D)
    bqkv = jnp.concatenate([bq * scale, bk, bv], axis=1)       # (1, 3D)

    width = 3 * EMBED
    def row(v):                                                # (1, n) -> (1, 3D)
        return jnp.pad(v, ((0, 0), (0, width - v.shape[1])))

    vec_pack = jnp.concatenate(
        [row(ln1_g), row(ln1_b), row(ln2_g), row(ln2_b),
         row(bqkv), row(bo), row(b1), row(b2)], axis=0)        # (8, 3D)
    return wqkv, wo, w1, w2, vec_pack


def encoder_forward(x, packed):
    wqkv, wo, w1, w2, vec_pack = packed
    B, S, D = x.shape
    N = B * S
    x2d = x.reshape(N, D)                                      # contiguous, free

    def full(shape):
        return pl.BlockSpec(shape, lambda i: (0,) * len(shape))

    out2d = pl.pallas_call(
        encoder_kernel,
        out_shape=jax.ShapeDtypeStruct((N, D), x.dtype),
        grid_spec=pltpu.PrefetchScalarGridSpec(
            num_scalar_prefetch=0,
            grid=(1,),                                         # single program
            in_specs=[full((N, D)),
                      full(tuple(wqkv.shape)),
                      full(tuple(wo.shape)),
                      full(tuple(w1.shape)),
                      full(tuple(w2.shape)),
                      full(tuple(vec_pack.shape))],
            out_specs=full((N, D)),
        ),
        compiler_params=pltpu.CompilerParams(
            dimension_semantics=("arbitrary",)),
    )(x2d, wqkv, wo, w1, w2, vec_pack)
    return out2d.reshape(B, S, D)


# ---------------------------- pure-JAX reference ----------------------------
def encoder_reference(x, params):
    (ln1_g, ln1_b, wq, bq, wk, bk, wv, bv, wo, bo,
     ln2_g, ln2_b, w1, b1, w2, b2) = params

    def ln(t, g, b):
        mu = jnp.mean(t, axis=-1, keepdims=True)
        var = jnp.mean((t - mu) ** 2, axis=-1, keepdims=True)
        return (t - mu) * jax.lax.rsqrt(var + LN_EPS) * g + b

    h = ln(x, ln1_g, ln1_b)
    q = h @ wq + bq
    k = h @ wk + bk
    v = h @ wv + bv
    outs = []
    for hh in range(NUM_HEADS):
        lo = hh * HEAD_DIM
        qh, kh, vh = (q[..., lo:lo + HEAD_DIM],
                      k[..., lo:lo + HEAD_DIM],
                      v[..., lo:lo + HEAD_DIM])
        s = jnp.einsum('bqd,bkd->bqk', qh, kh) / np.sqrt(HEAD_DIM)
        p = jax.nn.softmax(s, axis=-1)
        outs.append(jnp.einsum('bqk,bkd->bqd', p, vh))
    attn = jnp.concatenate(outs, axis=-1) @ wo + bo
    x1 = x + attn
    h2 = ln(x1, ln2_g, ln2_b)
    ff = jax.nn.gelu(h2 @ w1 + b1, approximate=False) @ w2 + b2
    return x1 + ff


def init_params(key):
    ks = jax.random.split(key, 8)
    scale = 0.02
    ln1_g = jnp.ones((1, EMBED), jnp.float32)
    ln1_b = jnp.zeros((1, EMBED), jnp.float32)
    ln2_g = jnp.ones((1, EMBED), jnp.float32)
    ln2_b = jnp.zeros((1, EMBED), jnp.float32)
    wq = scale * jax.random.normal(ks[0], (EMBED, EMBED), jnp.float32)
    wk = scale * jax.random.normal(ks[1], (EMBED, EMBED), jnp.float32)
    wv = scale * jax.random.normal(ks[2], (EMBED, EMBED), jnp.float32)
    wo = scale * jax.random.normal(ks[3], (EMBED, EMBED), jnp.float32)
    bq = scale * jax.random.normal(ks[4], (1, EMBED), jnp.float32)
    bk = jnp.zeros((1, EMBED), jnp.float32)
    bv = jnp.zeros((1, EMBED), jnp.float32)
    bo = jnp.zeros((1, EMBED), jnp.float32)
    w1 = scale * jax.random.normal(ks[5], (EMBED, INTER), jnp.float32)
    b1 = scale * jax.random.normal(ks[6], (1, INTER), jnp.float32)
    w2 = scale * jax.random.normal(ks[7], (INTER, EMBED), jnp.float32)
    b2 = jnp.zeros((1, EMBED), jnp.float32)
    return (ln1_g, ln1_b, wq, bq, wk, bk, wv, bv, wo, bo,
            ln2_g, ln2_b, w1, b1, w2, b2)


if __name__ == "__main__":
    key = jax.random.PRNGKey(0)
    k_x, k_p = jax.random.split(key)
    x = jax.random.normal(k_x, (BATCH, SEQ, EMBED), jnp.float32)
    params = init_params(k_p)
    packed = pack_params(params)          # one-time parameter prep (outside kernel)

    out = encoder_forward(x, packed)
    out = jax.block_until_ready(out)

    ref = encoder_reference(x, params)
    # tolerance widened slightly (vs f64-exact) to cover the approximate EUP
    # reciprocal used for the softmax denominator; error budget is ~1e-5.
    np.testing.assert_allclose(np.asarray(out), np.asarray(ref),
                               rtol=5e-4, atol=5e-4)
    print("KERNEL_OK")
</pallas_src>

<mosaic_0001>
module attributes {stable_mosaic.version = 11 : i64} {
  func.func @encoder_kernel(%arg0: i32, %arg1: memref<16x32xf32, #tpu.memory_space<vmem>>, %arg2: memref<32x96xf32, #tpu.memory_space<vmem>>, %arg3: memref<32x32xf32, #tpu.memory_space<vmem>>, %arg4: memref<32x64xf32, #tpu.memory_space<vmem>>, %arg5: memref<64x32xf32, #tpu.memory_space<vmem>>, %arg6: memref<8x96xf32, #tpu.memory_space<vmem>>, %arg7: memref<16x32xf32, #tpu.memory_space<vmem>>) attributes {dimension_semantics = [#tpu.dimension_semantics<arbitrary>], iteration_bounds = array<i64: 1>, scalar_prefetch = 0 : i64, scratch_operands = 0 : i64, tpu.core_type = #tpu.core_type<tc>, window_params = [{pipeline_mode = #tpu.pipeline_mode<synchronous>, transform_indices = @transform_0, window_bounds = array<i64: 16, 32>}, {pipeline_mode = #tpu.pipeline_mode<synchronous>, transform_indices = @transform_1, window_bounds = array<i64: 32, 96>}, {pipeline_mode = #tpu.pipeline_mode<synchronous>, transform_indices = @transform_2, window_bounds = array<i64: 32, 32>}, {pipeline_mode = #tpu.pipeline_mode<synchronous>, transform_indices = @transform_3, window_bounds = array<i64: 32, 64>}, {pipeline_mode = #tpu.pipeline_mode<synchronous>, transform_indices = @transform_4, window_bounds = array<i64: 64, 32>}, {pipeline_mode = #tpu.pipeline_mode<synchronous>, transform_indices = @transform_5, window_bounds = array<i64: 8, 96>}, {pipeline_mode = #tpu.pipeline_mode<synchronous>, transform_indices = @transform_6, window_bounds = array<i64: 16, 32>}]} {
    %c0 = arith.constant 0 : index
    %c0_0 = arith.constant 0 : index
    %0 = vector.load %arg1[%c0, %c0_0] : memref<16x32xf32, #tpu.memory_space<vmem>>, vector<16x32xf32>
    %c0_1 = arith.constant 0 : index
    %c0_2 = arith.constant 0 : index
    %1 = vector.load %arg6[%c0_1, %c0_2] : memref<8x96xf32, #tpu.memory_space<vmem>>, vector<8x96xf32>
    %2 = vector.extract_strided_slice %1 {offsets = [0, 0], sizes = [1, 32], strides = [1, 1]} : vector<8x96xf32> to vector<1x32xf32>
    %3 = vector.extract_strided_slice %1 {offsets = [1, 0], sizes = [1, 32], strides = [1, 1]} : vector<8x96xf32> to vector<1x32xf32>
    %4 = vector.extract_strided_slice %1 {offsets = [2, 0], sizes = [1, 32], strides = [1, 1]} : vector<8x96xf32> to vector<1x32xf32>
    %5 = vector.extract_strided_slice %1 {offsets = [3, 0], sizes = [1, 32], strides = [1, 1]} : vector<8x96xf32> to vector<1x32xf32>
    %6 = vector.extract_strided_slice %1 {offsets = [4, 0], sizes = [1, 96], strides = [1, 1]} : vector<8x96xf32> to vector<1x96xf32>
    %7 = vector.extract_strided_slice %1 {offsets = [5, 0], sizes = [1, 32], strides = [1, 1]} : vector<8x96xf32> to vector<1x32xf32>
    %8 = vector.extract_strided_slice %1 {offsets = [6, 0], sizes = [1, 64], strides = [1, 1]} : vector<8x96xf32> to vector<1x64xf32>
    %9 = vector.extract_strided_slice %1 {offsets = [7, 0], sizes = [1, 32], strides = [1, 1]} : vector<8x96xf32> to vector<1x32xf32>
    %cst = arith.constant dense<0.000000e+00> : vector<16xf32>
    %10 = vector.multi_reduction <add>, %0, %cst [1] : vector<16x32xf32> to vector<16xf32>
    %11 = vector.shape_cast %10 : vector<16xf32> to vector<16x1xf32>
    %cst_3 = arith.constant 3.200000e+01 : f32
    %12 = vector.broadcast %cst_3 : f32 to vector<16x1xf32>
    %13 = arith.divf %11, %12 : vector<16x1xf32>
    %14 = vector.broadcast %13 : vector<16x1xf32> to vector<16x32xf32>
    %15 = arith.subf %0, %14 : vector<16x32xf32>
    %16 = arith.mulf %15, %15 : vector<16x32xf32>
    %cst_4 = arith.constant dense<0.000000e+00> : vector<16xf32>
    %17 = vector.multi_reduction <add>, %16, %cst_4 [1] : vector<16x32xf32> to vector<16xf32>
    %18 = vector.shape_cast %17 : vector<16xf32> to vector<16x1xf32>
    %cst_5 = arith.constant 3.200000e+01 : f32
    %19 = vector.broadcast %cst_5 : f32 to vector<16x1xf32>
    %20 = arith.divf %18, %19 : vector<16x1xf32>
    %21 = vector.broadcast %13 : vector<16x1xf32> to vector<16x32xf32>
    %22 = arith.subf %0, %21 : vector<16x32xf32>
    %cst_6 = arith.constant 9.99999974E-6 : f32
    %23 = vector.broadcast %cst_6 : f32 to vector<16x1xf32>
    %24 = arith.addf %20, %23 : vector<16x1xf32>
    %25 = math.rsqrt %24 : vector<16x1xf32>
    %26 = vector.broadcast %25 : vector<16x1xf32> to vector<16x32xf32>
    %27 = arith.mulf %22, %26 : vector<16x32xf32>
    %28 = vector.broadcast %2 : vector<1x32xf32> to vector<16x32xf32>
    %29 = arith.mulf %27, %28 : vector<16x32xf32>
    %30 = vector.broadcast %3 : vector<1x32xf32> to vector<16x32xf32>
    %31 = arith.addf %29, %30 : vector<16x32xf32>
    %c0_7 = arith.constant 0 : index
    %c0_8 = arith.constant 0 : index
    %32 = vector.load %arg2[%c0_7, %c0_8] : memref<32x96xf32, #tpu.memory_space<vmem>>, vector<32x96xf32>
    %cst_9 = arith.constant dense<0.000000e+00> : vector<16x96xf32>
    %33 = tpu.matmul %31, %32, %cst_9 {dimension_numbers = #tpu.dot_dimension_numbers<[1], [0], [0], [1], [0, 0, 1, 1], [], []>} : vector<16x32xf32>, vector<32x96xf32>, vector<16x96xf32> -> vector<16x96xf32>
    %34 = vector.broadcast %6 : vector<1x96xf32> to vector<16x96xf32>
    %35 = arith.addf %33, %34 : vector<16x96xf32>
    %36 = tpu.iota {dimensions = array<i32: 0>} : vector<16x16xi32>
    %37 = tpu.iota {dimensions = array<i32: 1>} : vector<16x16xi32>
    %38 = arith.xori %36, %37 : vector<16x16xi32>
    %c8_i32 = arith.constant 8 : i32
    %39 = vector.broadcast %c8_i32 : i32 to vector<16x16xi32>
    %40 = arith.cmpi slt, %38, %39 : vector<16x16xi32>
    %41 = vector.extract_strided_slice %35 {offsets = [0, 0], sizes = [16, 8], strides = [1, 1]} : vector<16x96xf32> to vector<16x8xf32>
    %42 = vector.extract_strided_slice %35 {offsets = [0, 32], sizes = [16, 8], strides = [1, 1]} : vector<16x96xf32> to vector<16x8xf32>
    %43 = vector.extract_strided_slice %35 {offsets = [0, 64], sizes = [16, 8], strides = [1, 1]} : vector<16x96xf32> to vector<16x8xf32>
    %cst_10 = arith.constant dense<0.000000e+00> : vector<16x16xf32>
    %44 = tpu.matmul %41, %42, %cst_10 {dimension_numbers = #tpu.dot_dimension_numbers<[1], [1], [0], [0], [0, 0, 1, 0], [], []>} : vector<16x8xf32>, vector<16x8xf32>, vector<16x16xf32> -> vector<16x16xf32>
    %cst_11 = arith.constant -1.000000e+30 : f32
    %45 = vector.broadcast %cst_11 : f32 to vector<16x16xf32>
    %46 = arith.select %40, %44, %45 : vector<16x16xi1>, vector<16x16xf32>
    %cst_12 = arith.constant dense<0xFF800000> : vector<16xf32>
    %47 = vector.multi_reduction <maximumf>, %46, %cst_12 [1] : vector<16x16xf32> to vector<16xf32>
    %48 = vector.shape_cast %47 : vector<16xf32> to vector<16x1xf32>
    %49 = vector.broadcast %48 : vector<16x1xf32> to vector<16x16xf32>
    %50 = arith.subf %46, %49 : vector<16x16xf32>
    %51 = math.exp %50 : vector<16x16xf32>
    %cst_13 = arith.constant dense<0.000000e+00> : vector<16xf32>
    %52 = vector.multi_reduction <add>, %51, %cst_13 [1] : vector<16x16xf32> to vector<16xf32>
    %53 = vector.shape_cast %52 : vector<16xf32> to vector<16x1xf32>
    %54 = tpu.reciprocal %53 {approx = true} : vector<16x1xf32> -> vector<16x1xf32>
    %55 = vector.broadcast %54 : vector<16x1xf32> to vector<16x16xf32>
    %56 = arith.mulf %51, %55 : vector<16x16xf32>
    %cst_14 = arith.constant dense<0.000000e+00> : vector<16x8xf32>
    %57 = tpu.matmul %56, %43, %cst_14 {dimension_numbers = #tpu.dot_dimension_numbers<[1], [0], [0], [1], [0, 0, 1, 1], [], []>} : vector<16x16xf32>, vector<16x8xf32>, vector<16x8xf32> -> vector<16x8xf32>
    %58 = vector.extract_strided_slice %35 {offsets = [0, 8], sizes = [16, 8], strides = [1, 1]} : vector<16x96xf32> to vector<16x8xf32>
    %59 = vector.extract_strided_slice %35 {offsets = [0, 40], sizes = [16, 8], strides = [1, 1]} : vector<16x96xf32> to vector<16x8xf32>
    %60 = vector.extract_strided_slice %35 {offsets = [0, 72], sizes = [16, 8], strides = [1, 1]} : vector<16x96xf32> to vector<16x8xf32>
    %cst_15 = arith.constant dense<0.000000e+00> : vector<16x16xf32>
    %61 = tpu.matmul %58, %59, %cst_15 {dimension_numbers = #tpu.dot_dimension_numbers<[1], [1], [0], [0], [0, 0, 1, 0], [], []>} : vector<16x8xf32>, vector<16x8xf32>, vector<16x16xf32> -> vector<16x16xf32>
    %cst_16 = arith.constant -1.000000e+30 : f32
    %62 = vector.broadcast %cst_16 : f32 to vector<16x16xf32>
    %63 = arith.select %40, %61, %62 : vector<16x16xi1>, vector<16x16xf32>
    %cst_17 = arith.constant dense<0xFF800000> : vector<16xf32>
    %64 = vector.multi_reduction <maximumf>, %63, %cst_17 [1] : vector<16x16xf32> to vector<16xf32>
    %65 = vector.shape_cast %64 : vector<16xf32> to vector<16x1xf32>
    %66 = vector.broadcast %65 : vector<16x1xf32> to vector<16x16xf32>
    %67 = arith.subf %63, %66 : vector<16x16xf32>
    %68 = math.exp %67 : vector<16x16xf32>
    %cst_18 = arith.constant dense<0.000000e+00> : vector<16xf32>
    %69 = vector.multi_reduction <add>, %68, %cst_18 [1] : vector<16x16xf32> to vector<16xf32>
    %70 = vector.shape_cast %69 : vector<16xf32> to vector<16x1xf32>
    %71 = tpu.reciprocal %70 {approx = true} : vector<16x1xf32> -> vector<16x1xf32>
    %72 = vector.broadcast %71 : vector<16x1xf32> to vector<16x16xf32>
    %73 = arith.mulf %68, %72 : vector<16x16xf32>
    %cst_19 = arith.constant dense<0.000000e+00> : vector<16x8xf32>
    %74 = tpu.matmul %73, %60, %cst_19 {dimension_numbers = #tpu.dot_dimension_numbers<[1], [0], [0], [1], [0, 0, 1, 1], [], []>} : vector<16x16xf32>, vector<16x8xf32>, vector<16x8xf32> -> vector<16x8xf32>
    %75 = vector.extract_strided_slice %35 {offsets = [0, 16], sizes = [16, 8], strides = [1, 1]} : vector<16x96xf32> to vector<16x8xf32>
    %76 = vector.extract_strided_slice %35 {offsets = [0, 48], sizes = [16, 8], strides = [1, 1]} : vector<16x96xf32> to vector<16x8xf32>
    %77 = vector.extract_strided_slice %35 {offsets = [0, 80], sizes = [16, 8], strides = [1, 1]} : vector<16x96xf32> to vector<16x8xf32>
    %cst_20 = arith.constant dense<0.000000e+00> : vector<16x16xf32>
    %78 = tpu.matmul %75, %76, %cst_20 {dimension_numbers = #tpu.dot_dimension_numbers<[1], [1], [0], [0], [0, 0, 1, 0], [], []>} : vector<16x8xf32>, vector<16x8xf32>, vector<16x16xf32> -> vector<16x16xf32>
    %cst_21 = arith.constant -1.000000e+30 : f32
    %79 = vector.broadcast %cst_21 : f32 to vector<16x16xf32>
    %80 = arith.select %40, %78, %79 : vector<16x16xi1>, vector<16x16xf32>
    %cst_22 = arith.constant dense<0xFF800000> : vector<16xf32>
    %81 = vector.multi_reduction <maximumf>, %80, %cst_22 [1] : vector<16x16xf32> to vector<16xf32>
    %82 = vector.shape_cast %81 : vector<16xf32> to vector<16x1xf32>
    %83 = vector.broadcast %82 : vector<16x1xf32> to vector<16x16xf32>
    %84 = arith.subf %80, %83 : vector<16x16xf32>
    %85 = math.exp %84 : vector<16x16xf32>
    %cst_23 = arith.constant dense<0.000000e+00> : vector<16xf32>
    %86 = vector.multi_reduction <add>, %85, %cst_23 [1] : vector<16x16xf32> to vector<16xf32>
    %87 = vector.shape_cast %86 : vector<16xf32> to vector<16x1xf32>
    %88 = tpu.reciprocal %87 {approx = true} : vector<16x1xf32> -> vector<16x1xf32>
    %89 = vector.broadcast %88 : vector<16x1xf32> to vector<16x16xf32>
    %90 = arith.mulf %85, %89 : vector<16x16xf32>
    %cst_24 = arith.constant dense<0.000000e+00> : vector<16x8xf32>
    %91 = tpu.matmul %90, %77, %cst_24 {dimension_numbers = #tpu.dot_dimension_numbers<[1], [0], [0], [1], [0, 0, 1, 1], [], []>} : vector<16x16xf32>, vector<16x8xf32>, vector<16x8xf32> -> vector<16x8xf32>
    %92 = vector.extract_strided_slice %35 {offsets = [0, 24], sizes = [16, 8], strides = [1, 1]} : vector<16x96xf32> to vector<16x8xf32>
    %93 = vector.extract_strided_slice %35 {offsets = [0, 56], sizes = [16, 8], strides = [1, 1]} : vector<16x96xf32> to vector<16x8xf32>
    %94 = vector.extract_strided_slice %35 {offsets = [0, 88], sizes = [16, 8], strides = [1, 1]} : vector<16x96xf32> to vector<16x8xf32>
    %cst_25 = arith.constant dense<0.000000e+00> : vector<16x16xf32>
    %95 = tpu.matmul %92, %93, %cst_25 {dimension_numbers = #tpu.dot_dimension_numbers<[1], [1], [0], [0], [0, 0, 1, 0], [], []>} : vector<16x8xf32>, vector<16x8xf32>, vector<16x16xf32> -> vector<16x16xf32>
    %cst_26 = arith.constant -1.000000e+30 : f32
    %96 = vector.broadcast %cst_26 : f32 to vector<16x16xf32>
    %97 = arith.select %40, %95, %96 : vector<16x16xi1>, vector<16x16xf32>
    %cst_27 = arith.constant dense<0xFF800000> : vector<16xf32>
    %98 = vector.multi_reduction <maximumf>, %97, %cst_27 [1] : vector<16x16xf32> to vector<16xf32>
    %99 = vector.shape_cast %98 : vector<16xf32> to vector<16x1xf32>
    %100 = vector.broadcast %99 : vector<16x1xf32> to vector<16x16xf32>
    %101 = arith.subf %97, %100 : vector<16x16xf32>
    %102 = math.exp %101 : vector<16x16xf32>
    %cst_28 = arith.constant dense<0.000000e+00> : vector<16xf32>
    %103 = vector.multi_reduction <add>, %102, %cst_28 [1] : vector<16x16xf32> to vector<16xf32>
    %104 = vector.shape_cast %103 : vector<16xf32> to vector<16x1xf32>
    %105 = tpu.reciprocal %104 {approx = true} : vector<16x1xf32> -> vector<16x1xf32>
    %106 = vector.broadcast %105 : vector<16x1xf32> to vector<16x16xf32>
    %107 = arith.mulf %102, %106 : vector<16x16xf32>
    %cst_29 = arith.constant dense<0.000000e+00> : vector<16x8xf32>
    %108 = tpu.matmul %107, %94, %cst_29 {dimension_numbers = #tpu.dot_dimension_numbers<[1], [0], [0], [1], [0, 0, 1, 1], [], []>} : vector<16x16xf32>, vector<16x8xf32>, vector<16x8xf32> -> vector<16x8xf32>
    %109 = tpu.concatenate %57, %74, %91, %108 in 1 : vector<16x8xf32>, vector<16x8xf32>, vector<16x8xf32>, vector<16x8xf32> -> vector<16x32xf32>
    %c0_30 = arith.constant 0 : index
    %c0_31 = arith.constant 0 : index
    %110 = vector.load %arg3[%c0_30, %c0_31] : memref<32x32xf32, #tpu.memory_space<vmem>>, vector<32x32xf32>
    %cst_32 = arith.constant dense<0.000000e+00> : vector<16x32xf32>
    %111 = tpu.matmul %109, %110, %cst_32 {dimension_numbers = #tpu.dot_dimension_numbers<[1], [0], [0], [1], [0, 0, 1, 1], [], []>} : vector<16x32xf32>, vector<32x32xf32>, vector<16x32xf32> -> vector<16x32xf32>
    %112 = vector.broadcast %7 : vector<1x32xf32> to vector<16x32xf32>
    %113 = arith.addf %111, %112 : vector<16x32xf32>
    %114 = arith.addf %0, %113 : vector<16x32xf32>
    %cst_33 = arith.constant dense<0.000000e+00> : vector<16xf32>
    %115 = vector.multi_reduction <add>, %114, %cst_33 [1] : vector<16x32xf32> to vector<16xf32>
    %116 = vector.shape_cast %115 : vector<16xf32> to vector<16x1xf32>
    %cst_34 = arith.constant 3.200000e+01 : f32
    %117 = vector.broadcast %cst_34 : f32 to vector<16x1xf32>
    %118 = arith.divf %116, %117 : vector<16x1xf32>
    %119 = vector.broadcast %118 : vector<16x1xf32> to vector<16x32xf32>
    %120 = arith.subf %114, %119 : vector<16x32xf32>
    %121 = arith.mulf %120, %120 : vector<16x32xf32>
    %cst_35 = arith.constant dense<0.000000e+00> : vector<16xf32>
    %122 = vector.multi_reduction <add>, %121, %cst_35 [1] : vector<16x32xf32> to vector<16xf32>
    %123 = vector.shape_cast %122 : vector<16xf32> to vector<16x1xf32>
    %cst_36 = arith.constant 3.200000e+01 : f32
    %124 = vector.broadcast %cst_36 : f32 to vector<16x1xf32>
    %125 = arith.divf %123, %124 : vector<16x1xf32>
    %126 = vector.broadcast %118 : vector<16x1xf32> to vector<16x32xf32>
    %127 = arith.subf %114, %126 : vector<16x32xf32>
    %cst_37 = arith.constant 9.99999974E-6 : f32
    %128 = vector.broadcast %cst_37 : f32 to vector<16x1xf32>
    %129 = arith.addf %125, %128 : vector<16x1xf32>
    %130 = math.rsqrt %129 : vector<16x1xf32>
    %131 = vector.broadcast %130 : vector<16x1xf32> to vector<16x32xf32>
    %132 = arith.mulf %127, %131 : vector<16x32xf32>
    %133 = vector.broadcast %4 : vector<1x32xf32> to vector<16x32xf32>
    %134 = arith.mulf %132, %133 : vector<16x32xf32>
    %135 = vector.broadcast %5 : vector<1x32xf32> to vector<16x32xf32>
    %136 = arith.addf %134, %135 : vector<16x32xf32>
    %c0_38 = arith.constant 0 : index
    %c0_39 = arith.constant 0 : index
    %137 = vector.load %arg4[%c0_38, %c0_39] : memref<32x64xf32, #tpu.memory_space<vmem>>, vector<32x64xf32>
    %cst_40 = arith.constant dense<0.000000e+00> : vector<16x64xf32>
    %138 = tpu.matmul %136, %137, %cst_40 {dimension_numbers = #tpu.dot_dimension_numbers<[1], [0], [0], [1], [0, 0, 1, 1], [], []>} : vector<16x32xf32>, vector<32x64xf32>, vector<16x64xf32> -> vector<16x64xf32>
    %139 = vector.broadcast %8 : vector<1x64xf32> to vector<16x64xf32>
    %140 = arith.addf %138, %139 : vector<16x64xf32>
    %cst_41 = arith.constant 5.000000e-01 : f32
    %141 = vector.broadcast %cst_41 : f32 to vector<16x64xf32>
    %142 = arith.mulf %141, %140 : vector<16x64xf32>
    %cst_42 = arith.constant 0.707106769 : f32
    %143 = vector.broadcast %cst_42 : f32 to vector<16x64xf32>
    %144 = arith.mulf %140, %143 : vector<16x64xf32>
    %145 = math.erf %144 : vector<16x64xf32>
    %cst_43 = arith.constant 1.000000e+00 : f32
    %146 = vector.broadcast %cst_43 : f32 to vector<16x64xf32>
    %147 = arith.addf %146, %145 : vector<16x64xf32>
    %148 = arith.mulf %142, %147 : vector<16x64xf32>
    %c0_44 = arith.constant 0 : index
    %c0_45 = arith.constant 0 : index
    %149 = vector.load %arg5[%c0_44, %c0_45] : memref<64x32xf32, #tpu.memory_space<vmem>>, vector<64x32xf32>
    %cst_46 = arith.constant dense<0.000000e+00> : vector<16x32xf32>
    %150 = tpu.matmul %148, %149, %cst_46 {dimension_numbers = #tpu.dot_dimension_numbers<[1], [0], [0], [1], [0, 0, 1, 1], [], []>} : vector<16x64xf32>, vector<64x32xf32>, vector<16x32xf32> -> vector<16x32xf32>
    %151 = vector.broadcast %9 : vector<1x32xf32> to vector<16x32xf32>
    %152 = arith.addf %150, %151 : vector<16x32xf32>
    %153 = arith.addf %114, %152 : vector<16x32xf32>
    %c0_47 = arith.constant 0 : index
    %c0_48 = arith.constant 0 : index
    %154 = vector.load %arg7[%c0_47, %c0_48] : memref<16x32xf32, #tpu.memory_space<vmem>>, vector<16x32xf32>
    tpu.vector_store %arg7[%c0_47, %c0_48], %153 {strides = array<i32>} : memref<16x32xf32, #tpu.memory_space<vmem>>, vector<16x32xf32>,
    return
  }
  func.func @transform_0(%arg0: i32) -> (i32, i32) {
    %c0_i32 = arith.constant 0 : i32
    %c0_i32_0 = arith.constant 0 : i32
    %c0_i32_1 = arith.constant 0 : i32
    return %c0_i32, %c0_i32_0 : i32, i32
  }
  func.func @transform_1(%arg0: i32) -> (i32, i32) {
    %c0_i32 = arith.constant 0 : i32
    %c0_i32_0 = arith.constant 0 : i32
    %c0_i32_1 = arith.constant 0 : i32
    return %c0_i32, %c0_i32_0 : i32, i32
  }
  func.func @transform_2(%arg0: i32) -> (i32, i32) {
    %c0_i32 = arith.constant 0 : i32
    %c0_i32_0 = arith.constant 0 : i32
    %c0_i32_1 = arith.constant 0 : i32
    return %c0_i32, %c0_i32_0 : i32, i32
  }
  func.func @transform_3(%arg0: i32) -> (i32, i32) {
    %c0_i32 = arith.constant 0 : i32
    %c0_i32_0 = arith.constant 0 : i32
    %c0_i32_1 = arith.constant 0 : i32
    return %c0_i32, %c0_i32_0 : i32, i32
  }
  func.func @transform_4(%arg0: i32) -> (i32, i32) {
    %c0_i32 = arith.constant 0 : i32
    %c0_i32_0 = arith.constant 0 : i32
    %c0_i32_1 = arith.constant 0 : i32
    return %c0_i32, %c0_i32_0 : i32, i32
  }
  func.func @transform_5(%arg0: i32) -> (i32, i32) {
    %c0_i32 = arith.constant 0 : i32
    %c0_i32_0 = arith.constant 0 : i32
    %c0_i32_1 = arith.constant 0 : i32
    return %c0_i32, %c0_i32_0 : i32, i32
  }
  func.func @transform_6(%arg0: i32) -> (i32, i32) {
    %c0_i32 = arith.constant 0 : i32
    %c0_i32_0 = arith.constant 0 : i32
    %c0_i32_1 = arith.constant 0 : i32
    return %c0_i32, %c0_i32_0 : i32, i32
  }
}

</mosaic_0001>

<bundles_post_ra>
// kernel: tpu_custom_call.1
= control target key start
LH: loop header
LB: loop body
LE: loop exit
PB: predicated region body
PF: predicated region fallthrough
CT: control target
= control target key end

     0   :  { %11 = vsyncpa [#allocation3], 0  ;;  %s2113_s0 = inlined_call_operand.hbm [shape: f32[16,32], index: 0, kind: input, shape index: {}]   ;;  %s2114_s1 = inlined_call_operand.vmem [shape: f32[32,96], index: 1, kind: input, shape index: {}]   ;;  %s2115_s2 = inlined_call_operand.vmem [shape: f32[32,32], index: 2, kind: input, shape index: {}]   ;;  %s2116_s3 = inlined_call_operand.vmem [shape: f32[32,64], index: 3, kind: input, shape index: {}]   ;;  %s2117_s4 = inlined_call_operand.vmem [shape: f32[64,32], index: 4, kind: input, shape index: {}]   ;;  %s2118_s5 = inlined_call_operand.vmem [shape: f32[8,96], index: 5, kind: input, shape index: {}]   ;;  %s2119_s6 = inlined_call_operand.hbm [shape: f32[16,32], index: 6, kind: output, shape index: {}]  }
   0x1   :  { %12 = vsyncpa [#allocation4], 0  ;;  %s1790_s21 = smov [#allocation2]   ;;  %s1742_s25 = scalar_lea.hbm %s2113_s0, 256 }
   0x2   :  { %s18_s22 = sshll.u32 %s1790_s21, 4  ;;  %p1743_p0 = scmp.ne.s32.totalorder %s2113_s0, %s1742_s25  ;;  %s19_s22 = int_to_ptr.vmem [resolvable:$true] %s18_s22 }
   0x3   :  { %p1746_p1 = scmp.lt.u32.totalorder %s1742_s25, %s2113_s0 }
   0x5   :  { %p1748_p2 = pnand %p1746_p1, %p1743_p0 }
   0x7   :  { %1751 = shalt.err (!%p1748_p2)
}
   0x8   :  { %s1752_s30 = scalar_lea.vmem %s19_s22, 256  ;;  %p1757_p4 = scmp.lt.s32.totalorder %s19_s22, %s19_s22 }
   0x9   :  { %p1753_p3 = scmp.ne.s32.totalorder %s19_s22, %s1752_s30  ;;  %p1758_p5 = scmp.lt.s32.totalorder %s1752_s30, %s1752_s30 }
   0xb   :  { %p1759_p6 = por %p1758_p5, %p1757_p4 }
   0xd   :  { %p1760_p7 = pnand %p1759_p6, %p1753_p3 }
   0xf   :  { %1763 = shalt.err (!%p1760_p7)
}
  0x10   :  { %s1791_s7 = smov 128   ;;  %s1792_s8 = smov 8  }
  0x11   :  { %24 = dma.hbm_to_vmem [thread:$0]  %s2113_s0, 256, %s19_s22, [#allocation3], %s1791_s7, %s1791_s7, %s1792_s8  }
  0x12   :  { %1786 = dma.done.wait [#allocation3], 256  }
  0x13   :  { %1787 = vsyncadd [#allocation3], 4294967040  ;;  %vm41_vm0 = vcmask 261120   ;;  %v1857_v0 = vld [vmem:[#allocation2] sm:$0xff]  ;;  %v1859_v1 = vld [vmem:[#allocation2 + $0x8] sm:$0xff]  ;;  %v69_v22 = vlaneseq  ;;  %vm185_vm1 = vcmask 64512  }
  0x14   :  { %v42_v2 = vsel %vm41_vm0, %v1857_v0, 0.0  ;;  %v45_v3 = vsel %vm41_vm0, %v1859_v1, 0.0  ;;  %v81_v14 = vld [vmem:[%s2114_s1] sm:$0xff]  ;;  %v82_v15 = vld [vmem:[%s2114_s1 + $0x8] sm:$0xff]  ;;  %v83_v16 = vld [vmem:[%s2114_s1 + $0x10] sm:$0xff]  ;;  %s1794_s19 = smov 96  }
  0x15   :  { %43 = vadd.xlane.f32.xlu0 %v42_v2  ;;  %v1561_v17 = vpack.c.bf16 %v82_v15, %v81_v14  ;;  %v84_v18 = vld [vmem:[%s2114_s1 + $0x18] sm:$0xff]  ;;  %v1881_v26 = vshrl.u32 %v69_v22, 7  ;;  %v1887_v29 = vld [vmem:[%s2118_s5] sm:$0xff]  ;;  %s1793_s5 = smov 88   ;;  %s1795_s20 = smov 120   ;;  %vm1912_vm2 = vmpackc.low %vm185_vm1, %vm185_vm1  ;;  %v174_v60 = vand.u32 127, %v69_v22 }
  0x16   :  { %v1565_v19 = vpack.c.bf16 %v84_v18, %v83_v16  ;;  %vm271_vm5 = vcmask 130048   ;;  %s1796_s21 = smov 56   ;;  %s1797_s22 = smov 64   ;;  %vm1015_vm6 = vcmask 195584   ;;  %vm1258_vm7 = vcmask 523264  }
  0x17   :  { %1562 = vmatprep.subr.bf16.mxu1 %v1561_v17  ;;  %v71_v28 = vsub.s32 0, %v1881_v26  ;;  %v77_v30 = vsub.s32 1, %v1881_v26  ;;  %v87_v41 = vsub.s32 4, %v1881_v26  ;;  %v172_v59 = vadd.s32 8, %v1881_v26  ;;  %s1798_s23 = smov 80   ;;  %s1799_s24 = smov 112  }
  0x18   :  { %1564 = vmatpush3.bf16.msra.mxu1 %v1561_v17  ;;  %v175_v62 = vxor.u32 %v174_v60, %v1881_v26  ;;  %s1800_s25 = smov 48   ;;  %s1801_s26 = smov 104  }
  0x19   :  { %46 = vadd.xlane.f32.xlu0 %v45_v3  ;;  %1566 = vmatprep.subr.bf16.mxu1 %v1565_v19  ;;  %v72_v31 = vrot.slane %v1887_v29, %v71_v28  ;;  %v78_v34 = vrot.slane %v1887_v29, %v77_v30  ;;  %v88_v42 = vrot.slane %v1887_v29, %v87_v41  ;;  %s1802_s27 = smov 72   ;;  %s1803_s28 = smov 40  }
  0x1a   :  { %v176_v61 = vxor.u32 %v174_v60, %v172_v59  ;;  %vm1934_vm4 = vcmp.lt.s32.totalorder %v175_v62, 8  ;;  %s1804_s29 = smov 16   ;;  %s1805_s15 = smov 24  }
  0x1c   :  { %1568 = vmatpush3.bf16.msra.mxu1 %v1565_v19  ;;  %vm1930_vm3 = vcmp.lt.s32.totalorder %v176_v61, 8 }
  0xa2   :  { %v44_v4 = vpop.xlane.xlu0 %43 }
  0xa3   :  { %v49_v5 = vmul.f32 0.03125, %v44_v4 }
  0xa5   :  { %v51_v6 = vsub.f32 %v1857_v0, %v49_v5 }
  0xa6   :  { %v47_v7 = vpop.xlane.xlu0 %46 }
  0xa7   :  { %v50_v8 = vmul.f32 0.03125, %v47_v7  ;;  %v53_v9 = vmul.f32 %v51_v6, %v51_v6 }
  0xa9   :  { %v52_v10 = vsub.f32 %v1859_v1, %v50_v8  ;;  %v55_v11 = vsel %vm41_vm0, %v53_v9, 0.0 }
  0xaa   :  { %56 = vadd.xlane.f32.xlu1 %v55_v11 }
  0xab   :  { %v54_v12 = vmul.f32 %v52_v10, %v52_v10 }
  0xad   :  { %v58_v13 = vsel %vm41_vm0, %v54_v12, 0.0 }
  0xae   :  { %59 = vadd.xlane.f32.xlu1 %v58_v13 }
 0x137   :  { %v57_v20 = vpop.xlane.xlu1 %56 }
 0x138   :  { %v61_v21 = vmul.f32 0.03125, %v57_v20 }
 0x13a   :  { %v63_v23 = vadd.f32 1e-05, %v61_v21 }
 0x13b   :  { %v60_v24 = vpop.xlane.xlu1 %59 }
 0x13c   :  { %1698 = vrsqrt.f32 %v63_v23  ;;  %v62_v25 = vmul.f32 0.03125, %v60_v24 }
 0x13e   :  { %v64_v27 = vadd.f32 1e-05, %v62_v25 }
 0x140   :  { %1700 = vrsqrt.f32 %v64_v27 }
 0x146   :  { %v1699_v32 = vpop.eup %1698 }
 0x147   :  { %v67_v33 = vmul.f32 %v1699_v32, %v51_v6 }
 0x149   :  { %v73_v35 = vmul.f32 %v72_v31, %v67_v33 }
 0x14a   :  { %v1701_v36 = vpop.eup %1700 }
 0x14b   :  { %v68_v37 = vmul.f32 %v1701_v36, %v52_v10  ;;  %v79_v38 = vadd.f32 %v78_v34, %v73_v35 }
 0x14d   :  { %v74_v39 = vmul.f32 %v72_v31, %v68_v37  ;;  %1461 = vmatprep.mubr.msk.f32.mxu1 %vm41_vm0, %v79_v38 }
 0x14f   :  { %v80_v40 = vadd.f32 %v78_v34, %v74_v39 }
 0x151   :  { %1462 = vmatmul.mubr.msk.f32.vlgmr.msra.gmra.mrb[0].mxu1 %vm41_vm0, %v80_v40 }
 0x224   :  { %v1463_v43 = vpop.f32.mrb[0].mxu1 }
 0x225   :  { %v1896_v44 = vadd.f32 %v1463_v43, %v88_v42  ;;  %v161_v45 = vpop.f32.mrb[1].mxu1 }
 0x226   :  { %v1898_v46 = vadd.f32 %v161_v45, %v88_v42 }
 0x228   :  { %1468 = vmatprep.mubr.msk.f32.mxu1 %vm185_vm1, %v1898_v46  ;;  %v1904_v47 = vpack.i.bf16 %v1896_v44, %v1898_v46 }
 0x22a   :  { %1664 = vrot.lane.b32.xlu1 %v1904_v47, %s1793_s5  ;;  %1659 = vrot.lane.b32.xlu0 %v1904_v47, %s1794_s19 }
 0x22e   :  { %381 = vrot.lane.b32.xlu1 %v1898_v46, %s1795_s20 }
 0x232   :  { %383 = vrot.lane.b32.xlu1 %v1896_v44, %s1795_s20 }
 0x29c   :  { %v1665_v48 = vpop.permute.xlu1 %1664  ;;  %v1660_v49 = vpop.permute.xlu0 %1659 }
 0x29d   :  { %v1667_v50 = vunpack.i.h.bf16 %v1665_v48  ;;  %v1666_v51 = vunpack.i.l.bf16 %v1665_v48  ;;  %v1662_v52 = vunpack.i.h.bf16 %v1660_v49  ;;  %v1661_v53 = vunpack.i.l.bf16 %v1660_v49 }
 0x29f   :  { %v1569_v55 = vpack.c.bf16 %v1662_v52, %v1661_v53  ;;  %v1579_v56 = vpack.c.bf16 %v1667_v50, %v1666_v51 }
 0x2a0   :  { %v382_v57 = vpop.permute.xlu1 %381 }
 0x2a1   :  { %1571 = vmatprep.subr.msk.bf16.mxu1 %vm1912_vm2, %v1569_v55 }
 0x2a2   :  { %1574 = vmatpush3.bf16.xpose.msk.msra.mxu1 %vm1912_vm2, %v1569_v55 }
 0x2a3   :  { %1581 = vmatprep.subr.msk.bf16.mxu1 %vm1912_vm2, %v1579_v56 }
 0x2a4   :  { %v384_v58 = vpop.permute.xlu1 %383 }
 0x2a9   :  { %1469 = vmatmul.mubr.msk.f32.vlgmr.msra.gmra.mrb[2].mxu1 %vm185_vm1, %v1896_v44 }
 0x2aa   :  { %1584 = vmatpush3.bf16.xpose.msk.msra.mxu1 %vm1912_vm2, %v1579_v56  ;;  %1482 = vmatprep.mubr.msk.f32.mxu1 %vm185_vm1, %v382_v57 }
 0x2b1   :  { %1483 = vmatmul.mubr.msk.f32.vlgmr.msra.gmra.mrb[4].mxu1 %vm185_vm1, %v384_v58 }
 0x37c   :  { %v1470_v3 = vpop.f32.mrb[2].mxu1 }
 0x37d   :  { %v270_v4 = vsel %vm1930_vm3, %v1470_v3, -1e+30  ;;  %v260_v5 = vpop.f32.mrb[3].mxu1 }
 0x37e   :  { %v269_v6 = vsel %vm1934_vm4, %v260_v5, -1e+30  ;;  %v275_v7 = vsel %vm271_vm5, %v270_v4, -inf }
 0x37f   :  { %276 = vmax.xlane.f32.xlu1 %v275_v7  ;;  %v272_v8 = vsel %vm271_vm5, %v269_v6, -inf }
 0x380   :  { %273 = vmax.xlane.f32.xlu0 %v272_v8 }
 0x384   :  { %v1484_v9 = vpop.f32.mrb[4].mxu1 }
 0x385   :  { %v463_v10 = vpop.f32.mrb[5].mxu1  ;;  %v473_v13 = vsel %vm1930_vm3, %v1484_v9, -1e+30 }
 0x386   :  { %v472_v11 = vsel %vm1934_vm4, %v463_v10, -1e+30  ;;  %v477_v14 = vsel %vm271_vm5, %v473_v13, -inf }
 0x387   :  { %v474_v12 = vsel %vm271_vm5, %v472_v11, -inf }
 0x388   :  { %475 = vmax.xlane.f32.xlu0 %v474_v12 }
 0x38c   :  { %478 = vmax.xlane.f32.xlu0 %v477_v14 }
 0x40c   :  { %v277_v15 = vpop.xlane.xlu1 %276 }
 0x40d   :  { %v279_v16 = vsub.f32 %v270_v4, %v277_v15  ;;  %v274_v17 = vpop.xlane.xlu0 %273 }
 0x40e   :  { %v278_v18 = vsub.f32 %v269_v6, %v274_v17 }
 0x40f   :  { %v282_v19 = vmul.f32 1.442695, %v279_v16 }
 0x410   :  { %v280_v20 = vmul.f32 1.442695, %v278_v18 }
 0x411   :  { %1702 = vpow2.f32 %v282_v19 }
 0x412   :  { %1704 = vpow2.f32 %v280_v20 }
 0x415   :  { %v476_v21 = vpop.xlane.xlu0 %475 }
 0x416   :  { %v480_v22 = vsub.f32 %v472_v11, %v476_v21 }
 0x418   :  { %v482_v23 = vmul.f32 1.442695, %v480_v22 }
 0x419   :  { %v479_v24 = vpop.xlane.xlu0 %478 }
 0x41a   :  { %1706 = vpow2.f32 %v482_v23  ;;  %v481_v25 = vsub.f32 %v473_v13, %v479_v24 }
 0x41b   :  { %v1703_v27 = vpop.eup %1702 }
 0x41c   :  { %v1705_v28 = vpop.eup %1704  ;;  %v484_v30 = vmul.f32 1.442695, %v481_v25  ;;  %v287_v31 = vsel %vm271_vm5, %v1703_v27, 0.0 }
 0x41d   :  { %288 = vadd.xlane.f32.xlu1 %v287_v31  ;;  %v284_v32 = vsel %vm271_vm5, %v1705_v28, 0.0 }
 0x41e   :  { %1708 = vpow2.f32 %v484_v30  ;;  %285 = vadd.xlane.f32.xlu0 %v284_v32 }
 0x424   :  { %v1707_v33 = vpop.eup %1706 }
 0x425   :  { %v486_v34 = vsel %vm271_vm5, %v1707_v33, 0.0 }
 0x426   :  { %487 = vadd.xlane.f32.xlu0 %v486_v34 }
 0x428   :  { %v1709_v35 = vpop.eup %1708 }
 0x429   :  { %v489_v36 = vsel %vm271_vm5, %v1709_v35, 0.0 }
 0x42a   :  { %490 = vadd.xlane.f32.xlu1 %v489_v36 }
 0x43b   :  { %1674 = vrot.lane.b32.xlu1 %v1904_v47, %s1796_s21 }
 0x43c   :  { %1669 = vrot.lane.b32.xlu0 %v1904_v47, %s1797_s22 }
 0x43f   :  { %1679 = vrot.lane.b32.xlu1 %v1904_v47, %s1798_s23 }
 0x440   :  { %585 = vrot.lane.b32.xlu0 %v1896_v44, %s1799_s24 }
 0x443   :  { %583 = vrot.lane.b32.xlu1 %v1898_v46, %s1799_s24 }
 0x4aa   :  { %v289_v38 = vpop.xlane.xlu1 %288 }
 0x4ab   :  { %v286_v37 = vpop.xlane.xlu0 %285 }
 0x4ac   :  { %1710 = vrcp.f32 %v286_v37 }
 0x4ad   :  { %1712 = vrcp.f32 %v289_v38 }
 0x4b3   :  { %v488_v39 = vpop.xlane.xlu0 %487 }
 0x4b4   :  { %1714 = vrcp.f32 %v488_v39 }
 0x4b6   :  { %v1711_v40 = vpop.eup %1710 }
 0x4b7   :  { %v491_v41 = vpop.xlane.xlu1 %490  ;;  %v1670_v42 = vpop.permute.xlu0 %1669  ;;  %v292_v43 = vmul.f32 %v1711_v40, %v1705_v28 }
 0x4b8   :  { %1716 = vrcp.f32 %v491_v41  ;;  %v1672_v45 = vunpack.i.h.bf16 %v1670_v42  ;;  %v1671_v48 = vunpack.i.l.bf16 %v1670_v42  ;;  %v1713_v50 = vpop.eup %1712 }
 0x4b9   :  { %1475 = vmatprep.mubr.msk.f32.mxu0 %vm271_vm5, %v292_v43  ;;  %v293_v57 = vmul.f32 %v1713_v50, %v1703_v27 }
 0x4ba   :  { %v1575_v49 = vpack.c.bf16 %v1672_v45, %v1671_v48 }
 0x4bb   :  { %v1675_v51 = vpop.permute.xlu1 %1674  ;;  %v586_v6 = vpop.permute.xlu0 %585 }
 0x4bc   :  { %v1677_v52 = vunpack.i.h.bf16 %v1675_v51  ;;  %v1676_v53 = vunpack.i.l.bf16 %v1675_v51  ;;  %1576 = vmatprep.subr.bf16.mxu0 %v1575_v49 }
 0x4bd   :  { %1578 = vmatpush3.bf16.msra.mxu0 %v1575_v49 }
 0x4be   :  { %v1715_v55 = vpop.eup %1714  ;;  %v1585_v56 = vpack.c.bf16 %v1677_v52, %v1676_v53 }
 0x4bf   :  { %v1680_v58 = vpop.permute.xlu1 %1679  ;;  %v494_v59 = vmul.f32 %v1715_v55, %v1707_v33 }
 0x4c0   :  { %v1682_v60 = vunpack.i.h.bf16 %v1680_v58  ;;  %v1681_v61 = vunpack.i.l.bf16 %v1680_v58  ;;  %1476 = vmatmul.mubr.msk.f32.vlgmr.msra.gmra.mrb[0].mxu0 %vm271_vm5, %v293_v57  ;;  %1586 = vmatprep.subr.bf16.mxu0 %v1585_v56 }
 0x4c1   :  { %1588 = vmatpush3.bf16.msra.mxu0 %v1585_v56  ;;  %1489 = vmatprep.mubr.msk.f32.mxu0 %vm271_vm5, %v494_v59 }
 0x4c2   :  { %v1717_v62 = vpop.eup %1716  ;;  %v1589_v3 = vpack.c.bf16 %v1682_v60, %v1681_v61 }
 0x4c3   :  { %v495_v4 = vmul.f32 %v1717_v62, %v1709_v35  ;;  %v584_v5 = vpop.permute.xlu1 %583 }
 0x4c4   :  { %1591 = vmatprep.subr.msk.bf16.mxu0 %vm1912_vm2, %v1589_v3 }
 0x4c5   :  { %1490 = vmatmul.mubr.msk.f32.vlgmr.msra.gmra.mrb[2].mxu0 %vm271_vm5, %v495_v4 }
 0x4c6   :  { %1496 = vmatprep.mubr.msk.f32.mxu0 %vm185_vm1, %v584_v5 }
 0x4ca   :  { %1594 = vmatpush3.bf16.xpose.msk.msra.mxu0 %vm1912_vm2, %v1589_v3 }
 0x4d1   :  { %1497 = vmatmul.mubr.msk.f32.vlgmr.msra.gmra.mrb[4].mxu0 %vm185_vm1, %v586_v6 }
 0x593   :  { %v1969_v7 = vpop.f32.mrb[0].mxu0 }
 0x594   :  { %v1971_v8 = vpop.f32.mrb[1].mxu0 }
 0x598   :  { %v1973_v9 = vpop.f32.mrb[2].mxu0 }
 0x599   :  { %v1975_v10 = vpop.f32.mrb[3].mxu0 }
 0x5a4   :  { %v1498_v11 = vpop.f32.mrb[4].mxu0 }
 0x5a5   :  { %v675_v12 = vsel %vm1930_vm3, %v1498_v11, -1e+30  ;;  %v665_v13 = vpop.f32.mrb[5].mxu0 }
 0x5a6   :  { %v674_v14 = vsel %vm1934_vm4, %v665_v13, -1e+30  ;;  %v679_v15 = vsel %vm271_vm5, %v675_v12, -inf }
 0x5a7   :  { %680 = vmax.xlane.f32.xlu0 %v679_v15  ;;  %v676_v16 = vsel %vm271_vm5, %v674_v14, -inf  ;;  %v1020_v15 = vld [vmem:[%s2115_s2 + $0x10] sm:$0xff] }
 0x5a8   :  { %677 = vmax.xlane.f32.xlu1 %v676_v16 }
 0x5b9   :  { %1684 = vrot.lane.b32.xlu1 %v1904_v47, %s1800_s25 }
 0x5bd   :  { %785 = vrot.lane.b32.xlu1 %v1898_v46, %s1801_s26 }
 0x5c1   :  { %787 = vrot.lane.b32.xlu1 %v1896_v44, %s1801_s26 }
 0x634   :  { %v681_v17 = vpop.xlane.xlu0 %680 }
 0x635   :  { %v683_v18 = vsub.f32 %v675_v12, %v681_v17  ;;  %v678_v19 = vpop.xlane.xlu1 %677  ;;  %v1021_v17 = vld [vmem:[%s2115_s2 + $0x18] sm:$0xff] }
 0x636   :  { %v682_v20 = vsub.f32 %v674_v14, %v678_v19  ;;  %v1018_v14 = vld [vmem:[%s2115_s2] sm:$0xff] }
 0x637   :  { %v686_v21 = vmul.f32 1.442695, %v683_v18  ;;  %v1613_v18 = vpack.c.bf16 %v1021_v17, %v1020_v15  ;;  %v1246_v15 = vld [vmem:[%s2117_s4] sm:$0xff] }
 0x638   :  { %v684_v22 = vmul.f32 1.442695, %v682_v20 }
 0x639   :  { %1718 = vpow2.f32 %v686_v21  ;;  %v1685_v23 = vpop.permute.xlu1 %1684 }
 0x63a   :  { %v1687_v24 = vunpack.i.h.bf16 %v1685_v23  ;;  %v1686_v25 = vunpack.i.l.bf16 %v1685_v23  ;;  %1720 = vpow2.f32 %v684_v22 }
 0x63c   :  { %v1595_v27 = vpack.c.bf16 %v1687_v24, %v1686_v25 }
 0x63d   :  { %v786_v41 = vpop.permute.xlu1 %785 }
 0x63e   :  { %1596 = vmatprep.subr.bf16.mxu1 %v1595_v27 }
 0x63f   :  { %1598 = vmatpush3.bf16.msra.mxu1 %v1595_v27 }
 0x641   :  { %v788_v42 = vpop.permute.xlu1 %787 }
 0x643   :  { %v1719_v28 = vpop.eup %1718 }
 0x644   :  { %v691_v30 = vsel %vm271_vm5, %v1719_v28, 0.0  ;;  %v1721_v46 = vpop.eup %1720 }
 0x645   :  { %692 = vadd.xlane.f32.xlu0 %v691_v30  ;;  %v688_v44 = vsel %vm271_vm5, %v1721_v46, 0.0 }
 0x649   :  { %689 = vadd.xlane.f32.xlu0 %v688_v44 }
 0x65f   :  { %1689 = vrot.lane.b32.xlu0 %v1904_v47, %s1802_s27 }
 0x6d2   :  { %v693_v31 = vpop.xlane.xlu0 %692 }
 0x6d3   :  { %1722 = vrcp.f32 %v693_v31 }
 0x6d6   :  { %v690_v32 = vpop.xlane.xlu0 %689 }
 0x6d7   :  { %1724 = vrcp.f32 %v690_v32 }
 0x6da   :  { %v1690_v33 = vpop.permute.xlu0 %1689 }
 0x6db   :  { %v1692_v34 = vunpack.i.h.bf16 %v1690_v33  ;;  %v1691_v35 = vunpack.i.l.bf16 %v1690_v33  ;;  %v1024_v33 = vsub.s32 5, %v1881_v26 }
 0x6dd   :  { %v1599_v36 = vpack.c.bf16 %v1692_v34, %v1691_v35  ;;  %v1723_v37 = vpop.eup %1722 }
 0x6de   :  { %v697_v40 = vmul.f32 %v1723_v37, %v1719_v28 }
 0x6df   :  { %1601 = vmatprep.subr.msk.bf16.mxu1 %vm1912_vm2, %v1599_v36 }
 0x6e1   :  { %v1725_v38 = vpop.eup %1724 }
 0x6e2   :  { %v696_v39 = vmul.f32 %v1725_v38, %v1721_v46 }
 0x6e4   :  { %1503 = vmatprep.mubr.msk.f32.mxu1 %vm271_vm5, %v696_v39 }
 0x6e5   :  { %1504 = vmatmul.mubr.msk.f32.vlgmr.msra.gmra.mrb[6].mxu1 %vm271_vm5, %v697_v40 }
 0x6e6   :  { %1604 = vmatpush3.bf16.xpose.msk.msra.mxu1 %vm1912_vm2, %v1599_v36  ;;  %1510 = vmatprep.mubr.msk.f32.mxu1 %vm185_vm1, %v786_v41 }
 0x6ed   :  { %1511 = vmatmul.mubr.msk.f32.vlgmr.msra.gmra.mrb[8].mxu1 %vm185_vm1, %v788_v42 }
 0x7b8   :  { %v1505_v43 = vpop.f32.mrb[6].mxu1 }
 0x7b9   :  { %v776_v45 = vpop.f32.mrb[7].mxu1 }
 0x7c0   :  { %v1512_v48 = vpop.f32.mrb[8].mxu1 }
 0x7c1   :  { %v877_v49 = vsel %vm1930_vm3, %v1512_v48, -1e+30  ;;  %v867_v50 = vpop.f32.mrb[9].mxu1 }
 0x7c2   :  { %v876_v51 = vsel %vm1934_vm4, %v867_v50, -1e+30  ;;  %v881_v52 = vsel %vm271_vm5, %v877_v49, -inf }
 0x7c3   :  { %882 = vmax.xlane.f32.xlu0 %v881_v52  ;;  %v878_v54 = vsel %vm271_vm5, %v876_v51, -inf  ;;  %v1147_v52 = vld [vmem:[%s2116_s3] sm:$0xff] }
 0x7c4   :  { %879 = vmax.xlane.f32.xlu1 %v878_v54  ;;  %v1148_v54 = vld [vmem:[%s2116_s3 + $0x8] sm:$0xff] }
 0x7d5   :  { %1694 = vrot.lane.b32.xlu1 %v1904_v47, %s1803_s28 }
 0x7d9   :  { %991 = vrot.lane.b32.xlu1 %v1973_v9, %s1792_s8 }
 0x7dd   :  { %997 = vrot.lane.b32.xlu1 %v776_v45, %s1804_s29 }
 0x7e1   :  { %999 = vrot.lane.b32.xlu1 %v1505_v43, %s1804_s29 }
 0x850   :  { %v883_v63 = vpop.xlane.xlu0 %882 }
 0x851   :  { %v885_v53 = vsub.f32 %v877_v49, %v883_v63  ;;  %v880_v55 = vpop.xlane.xlu1 %879  ;;  %v1617_v63 = vpack.c.bf16 %v1148_v54, %v1147_v52 }
 0x852   :  { %v884_v2 = vsub.f32 %v876_v51, %v880_v55  ;;  %v1150_v55 = vld [vmem:[%s2116_s3 + $0x18] sm:$0xff] }
 0x853   :  { %v888_v56 = vmul.f32 1.442695, %v885_v53  ;;  %1618 = vmatprep.subr.bf16.mxu1 %v1617_v63  ;;  %v1149_v53 = vld [vmem:[%s2116_s3 + $0x10] sm:$0xff] }
 0x854   :  { %v886_v57 = vmul.f32 1.442695, %v884_v2  ;;  %1620 = vmatpush3.bf16.msra.mxu1 %v1617_v63  ;;  %v1621_v2 = vpack.c.bf16 %v1150_v55, %v1149_v53 }
 0x855   :  { %v1695_v58 = vpop.permute.xlu1 %1694 }
 0x856   :  { %1726 = vpow2.f32 %v886_v57  ;;  %v1697_v59 = vunpack.i.h.bf16 %v1695_v58  ;;  %v1696_v60 = vunpack.i.l.bf16 %v1695_v58  ;;  %1622 = vmatprep.subr.bf16.mxu1 %v1621_v2 }
 0x857   :  { %1728 = vpow2.f32 %v888_v56 }
 0x858   :  { %v1605_v61 = vpack.c.bf16 %v1697_v59, %v1696_v60  ;;  %1624 = vmatpush3.bf16.msra.mxu1 %v1621_v2 }
 0x859   :  { %v992_v21 = vpop.permute.xlu1 %991 }
 0x85a   :  { %1606 = vmatprep.subr.bf16.mxu0 %v1605_v61  ;;  %v1012_v28 = vsel %vm185_vm1, %v1969_v7, %v992_v21  ;;  %v1250_v21 = vld [vmem:[%s2117_s4 + $0x20] sm:$0xff] }
 0x85b   :  { %1608 = vmatpush3.bf16.msra.mxu0 %v1605_v61 }
 0x85d   :  { %v998_v22 = vpop.permute.xlu1 %997 }
 0x860   :  { %v1727_v47 = vpop.eup %1726 }
 0x861   :  { %v890_v62 = vsel %vm271_vm5, %v1727_v47, 0.0  ;;  %v1729_v3 = vpop.eup %1728  ;;  %v1000_v24 = vpop.permute.xlu1 %999 }
 0x862   :  { %891 = vadd.xlane.f32.xlu0 %v890_v62  ;;  %v893_v4 = vsel %vm271_vm5, %v1729_v3, 0.0  ;;  %v1014_v44 = vsel %vm271_vm5, %v1012_v28, %v1000_v24  ;;  %v1143_v62 = vsub.s32 3, %v1881_v26  ;;  %v1252_v24 = vld [vmem:[%s2117_s4 + $0x30] sm:$0xff]  ;;  %v1153_v28 = vsub.s32 6, %v1881_v26 }
 0x866   :  { %894 = vadd.xlane.f32.xlu0 %v893_v4 }
 0x87c   :  { %989 = vrot.lane.b32.xlu0 %v1975_v10, %s1792_s8  ;;  %v1019_v10 = vld [vmem:[%s2115_s2 + $0x8] sm:$0xff] }
 0x87d   :  { %v1609_v16 = vpack.c.bf16 %v1019_v10, %v1018_v14 }
 0x87f   :  { %1610 = vmatprep.subr.bf16.mxu0 %v1609_v16 }
 0x8ef   :  { %v892_v5 = vpop.xlane.xlu0 %891 }
 0x8f0   :  { %1730 = vrcp.f32 %v892_v5 }
 0x8f3   :  { %v895_v6 = vpop.xlane.xlu0 %894 }
 0x8f4   :  { %1732 = vrcp.f32 %v895_v6  ;;  %v1144_v6 = vrot.slane %v1887_v29, %v1143_v62 }
 0x8f7   :  { %v990_v23 = vpop.permute.xlu0 %989 }
 0x8f8   :  { %v1011_v25 = vsel %vm185_vm1, %v1971_v8, %v990_v23  ;;  %v1025_v8 = vrot.slane %v1887_v29, %v1024_v33 }
 0x8f9   :  { %v1013_v30 = vsel %vm271_vm5, %v1011_v25, %v998_v22  ;;  %v1251_v22 = vld [vmem:[%s2117_s4 + $0x28] sm:$0xff]  ;;  %v1253_v25 = vld [vmem:[%s2117_s4 + $0x38] sm:$0xff] }
 0x8fa   :  { %v1731_v9 = vpop.eup %1730  ;;  %v1633_v23 = vpack.c.bf16 %v1251_v22, %v1250_v21 }
 0x8fb   :  { %v898_v11 = vmul.f32 %v1731_v9, %v1727_v47  ;;  %v1137_v47 = vsub.s32 2, %v1881_v26 }
 0x8fd   :  { %1517 = vmatprep.mubr.msk.f32.mxu0 %vm271_vm5, %v898_v11 }
 0x8fe   :  { %v1733_v12 = vpop.eup %1732 }
 0x8ff   :  { %v899_v13 = vmul.f32 %v1733_v12, %v1729_v3  ;;  %v1138_v3 = vrot.slane %v1887_v29, %v1137_v47 }
 0x901   :  { %1518 = vmatmul.mubr.msk.f32.vlgmr.msra.gmra.mrb[6].mxu0 %vm271_vm5, %v899_v13 }
 0x902   :  { %1612 = vmatpush3.bf16.msra.mxu0 %v1609_v16  ;;  %v1247_v16 = vld [vmem:[%s2117_s4 + $0x8] sm:$0xff] }
 0x903   :  { %1614 = vmatprep.subr.bf16.mxu0 %v1613_v18  ;;  %v1625_v17 = vpack.c.bf16 %v1247_v16, %v1246_v15 }
 0x906   :  { %1616 = vmatpush3.bf16.msra.mxu0 %v1613_v18  ;;  %v1248_v18 = vld [vmem:[%s2117_s4 + $0x10] sm:$0xff] }
 0x907   :  { %1626 = vmatprep.subr.bf16.mxu0 %v1625_v17 }
 0x9d4   :  { %v1519_v19 = vpop.f32.mrb[6].mxu0 }
 0x9d5   :  { %1007 = vrot.lane.b32.xlu1 %v1519_v19, %s1805_s15  ;;  %v978_v20 = vpop.f32.mrb[7].mxu0  ;;  %v1249_v19 = vld [vmem:[%s2117_s4 + $0x18] sm:$0xff]  ;;  %s1806_s4 = smov [#allocation5]  }
 0x9d6   :  { %1005 = vrot.lane.b32.xlu0 %v978_v20, %s1805_s15  ;;  %v1629_v20 = vpack.c.bf16 %v1249_v19, %v1248_v18  ;;  %s1349_s13 = sshll.u32 %s1806_s4, 4  ;;  %s1350_s13 = int_to_ptr.vmem [resolvable:$true] %s1349_s13 }
 0x9d7   :  { %s1764_s14 = scalar_lea.vmem %s1350_s13, 256  ;;  %p1769_p9 = scmp.lt.s32.totalorder %s1350_s13, %s1350_s13 }
 0x9d8   :  { %p1765_p8 = scmp.ne.s32.totalorder %s1350_s13, %s1764_s14  ;;  %p1770_p10 = scmp.lt.s32.totalorder %s1764_s14, %s1764_s14 }
 0x9da   :  { %p1771_p11 = por %p1770_p10, %p1769_p9 }
 0x9dc   :  { %p1772_p12 = pnand %p1771_p11, %p1765_p8 }
 0xa47   :  { %v1008_v27 = vpop.permute.xlu1 %1007 }
 0xa48   :  { %v1006_v46 = vpop.permute.xlu0 %1005  ;;  %v1017_v32 = vsel %vm1015_vm6, %v1014_v44, %v1008_v27  ;;  %v1637_v27 = vpack.c.bf16 %v1253_v25, %v1252_v24 }
 0xa49   :  { %v1016_v31 = vsel %vm1015_vm6, %v1013_v30, %v1006_v46  ;;  %v1154_v30 = vrot.slane %v1887_v29, %v1153_v28 }
 0xa4a   :  { %1528 = vmatprep.mubr.msk.f32.mxu0 %vm41_vm0, %v1016_v31 }
 0xa4b   :  { %1529 = vmatmul.mubr.msk.f32.vlgmr.msra.gmra.mrb[8].mxu0 %vm41_vm0, %v1017_v32 }
 0xa4c   :  { %1628 = vmatpush3.bf16.msra.mxu0 %v1625_v17 }
 0xa4d   :  { %1630 = vmatprep.subr.bf16.mxu0 %v1629_v20 }
 0xa50   :  { %1632 = vmatpush3.bf16.msra.mxu0 %v1629_v20 }
 0xa51   :  { %1634 = vmatprep.subr.bf16.mxu0 %v1633_v23 }
 0xa54   :  { %1636 = vmatpush3.bf16.msra.mxu0 %v1633_v23 }
 0xa55   :  { %1638 = vmatprep.subr.bf16.mxu0 %v1637_v27 }
 0xa58   :  { %1640 = vmatpush3.bf16.msra.mxu0 %v1637_v27 }
 0xb1e   :  { %v1530_v34 = vpop.f32.mrb[8].mxu0 }
 0xb1f   :  { %v1104_v35 = vadd.f32 %v1530_v34, %v1025_v8  ;;  %v1098_v36 = vpop.f32.mrb[9].mxu0 }
 0xb20   :  { %v1099_v37 = vadd.f32 %v1098_v36, %v1025_v8 }
 0xb21   :  { %v2035_v7 = vadd.f32 %v1104_v35, %v1859_v1 }
 0xb22   :  { %v2038_v38 = vadd.f32 %v1099_v37, %v1857_v0 }
 0xb23   :  { %v1112_v39 = vsel %vm41_vm0, %v2035_v7, 0.0 }
 0xb24   :  { %1113 = vadd.xlane.f32.xlu1 %v1112_v39  ;;  %v1109_v40 = vsel %vm41_vm0, %v2038_v38, 0.0 }
 0xb25   :  { %1110 = vadd.xlane.f32.xlu0 %v1109_v40 }
 0xbb1   :  { %v1114_v41 = vpop.xlane.xlu1 %1113 }
 0xbb2   :  { %v1116_v42 = vmul.f32 0.03125, %v1114_v41  ;;  %v1111_v43 = vpop.xlane.xlu0 %1110 }
 0xbb3   :  { %v1115_v45 = vmul.f32 0.03125, %v1111_v43  ;;  %v1256_v43 = vsub.s32 7, %v1881_v26 }
 0xbb4   :  { %v1118_v48 = vsub.f32 %v2035_v7, %v1116_v42 }
 0xbb5   :  { %v1117_v1 = vsub.f32 %v2038_v38, %v1115_v45  ;;  %v1257_v45 = vrot.slane %v1887_v29, %v1256_v43 }
 0xbb6   :  { %v1120_v50 = vmul.f32 %v1118_v48, %v1118_v48 }
 0xbb7   :  { %v1119_v49 = vmul.f32 %v1117_v1, %v1117_v1 }
 0xbb8   :  { %v1124_v51 = vsel %vm41_vm0, %v1120_v50, 0.0 }
 0xbb9   :  { %v1121_v0 = vsel %vm41_vm0, %v1119_v49, 0.0 }
 0xbba   :  { %1122 = vadd.xlane.f32.xlu0 %v1121_v0 }
 0xbbe   :  { %1125 = vadd.xlane.f32.xlu0 %v1124_v51 }
 0xc47   :  { %v1123_v56 = vpop.xlane.xlu0 %1122 }
 0xc48   :  { %v1127_v57 = vmul.f32 0.03125, %v1123_v56 }
 0xc4a   :  { %v1129_v58 = vadd.f32 1e-05, %v1127_v57 }
 0xc4b   :  { %v1126_v59 = vpop.xlane.xlu0 %1125 }
 0xc4c   :  { %1734 = vrsqrt.f32 %v1129_v58  ;;  %v1128_v60 = vmul.f32 0.03125, %v1126_v59 }
 0xc4e   :  { %v1130_v61 = vadd.f32 1e-05, %v1128_v60 }
 0xc50   :  { %1736 = vrsqrt.f32 %v1130_v61 }
 0xc56   :  { %v1735_v4 = vpop.eup %1734 }
 0xc57   :  { %v1133_v5 = vmul.f32 %v1735_v4, %v1117_v1 }
 0xc59   :  { %v1139_v9 = vmul.f32 %v1138_v3, %v1133_v5 }
 0xc5a   :  { %v1737_v11 = vpop.eup %1736 }
 0xc5b   :  { %v1134_v12 = vmul.f32 %v1737_v11, %v1118_v48  ;;  %v1145_v13 = vadd.f32 %v1144_v6, %v1139_v9 }
 0xc5d   :  { %v1140_v14 = vmul.f32 %v1138_v3, %v1134_v12  ;;  %1539 = vmatprep.mubr.msk.f32.mxu1 %vm41_vm0, %v1145_v13 }
 0xc5f   :  { %v1146_v10 = vadd.f32 %v1144_v6, %v1140_v14 }
 0xc61   :  { %1540 = vmatmul.mubr.msk.f32.vlgmr.msra.gmra.mrb[10].mxu1 %vm41_vm0, %v1146_v10 }
 0xd34   :  { %v1541_v46 = vpop.f32.mrb[10].mxu1 }
 0xd35   :  { %v1233_v44 = vadd.f32 %v1541_v46, %v1154_v30  ;;  %v1227_v31 = vpop.f32.mrb[11].mxu1 }
 0xd36   :  { %v1228_v32 = vadd.f32 %v1227_v31, %v1154_v30 }
 0xd37   :  { %v1239_v33 = vmul.f32 0.70710677, %v1233_v44  ;;  %v1237_v40 = vmul.f32 0.5, %v1233_v44 }
 0xd38   :  { %v1238_v8 = vmul.f32 0.70710677, %v1228_v32  ;;  %v1236_v37 = vmul.f32 0.5, %v1228_v32 }
 0xd39   :  { %1738 = verf.f32 %v1239_v33 }
 0xd3a   :  { %1740 = verf.f32 %v1238_v8 }
 0xd43   :  { %v1739_v34 = vpop.eup %1738 }
 0xd44   :  { %v1741_v35 = vpop.eup %1740  ;;  %v1243_v36 = vadd.f32 1.0, %v1739_v34 }
 0xd45   :  { %v1242_v39 = vadd.f32 1.0, %v1741_v35 }
 0xd46   :  { %v1245_v42 = vmul.f32 %v1243_v36, %v1237_v40 }
 0xd47   :  { %v1244_v41 = vmul.f32 %v1242_v39, %v1236_v37 }
 0xd49   :  { %1558 = vmatprep.mubr.msk.f32.mxu0 %vm1258_vm7, %v1244_v41 }
 0xd4a   :  { %1559 = vmatmul.mubr.msk.f32.vlgmr.msra.gmra.mrb[10].mxu0 %vm1258_vm7, %v1245_v42 }
 0xe1d   :  { %v1560_v48 = vpop.f32.mrb[10].mxu0 }
 0xe1e   :  { %v1337_v1 = vadd.f32 %v1560_v48, %v1257_v45  ;;  %v1331_v49 = vpop.f32.mrb[11].mxu0 }
 0xe1f   :  { %v1332_v0 = vadd.f32 %v1331_v49, %v1257_v45 }
 0xe20   :  { %v1341_v50 = vadd.f32 %v1337_v1, %v2035_v7 }
 0xe21   :  { %v1340_v51 = vadd.f32 %v1332_v0, %v2038_v38 }
 0xe22   :  { %1343 = vst.msk [vmem:[#allocation5 + $0x8] sm:$0xff] %vm41_vm0, %v1341_v50 }
 0xe23   :  { %1342 = vst.msk [vmem:[#allocation5] sm:$0xff] %vm41_vm0, %v1340_v51 }
 0xe24   :  { %1775 = shalt.err (!%p1772_p12)
}
 0xe25   :  { %s1776_s16 = scalar_lea.hbm %s2119_s6, 256 }
 0xe26   :  { %p1777_p13 = scmp.ne.s32.totalorder %s2119_s6, %s1776_s16  ;;  %p1780_p0 = scmp.lt.u32.totalorder %s1776_s16, %s2119_s6 }
 0xe28   :  { %p1782_p1 = pnand %p1780_p0, %p1777_p13 }
 0xe2a   :  { %1785 = shalt.err (!%p1782_p1)
}
 0xe2b   :  { %1355 = dma.vmem_to_hbm [thread:$0]  %s1350_s13, 256, %s2119_s6, [#allocation4], %s1791_s7, %s1791_s7, %s1792_s8  }
 0xe2c   :  { %1788 = dma.done.wait [#allocation4], 256  }
 0xe2d   :  { %1789 = vsyncadd [#allocation4], 4294967040 }
 0xe2e   :  { %1359 = vsyncpa [#allocation3], 1 }
 0xe2f   :  { %1360 = vsyncpa [#allocation4], 1 }

</bundles_post_ra>
